<compile_context>
chip_gen: v6e
topology: v6e:2x2x1
jax: 0.10.0
libtpu: 0.0.40
codegen_flags: <defaults>
</compile_context>

<pallas_src>
import functools
import math

import jax
import jax.numpy as jnp
from jax.experimental import pallas as pl
from jax.experimental.pallas import tpu as pltpu


def _round_up(x, m):
    return (x + m - 1) // m * m


def _vmem_limit_bytes():
    try:
        cap = int(pltpu.get_tpu_info().vmem_capacity_bytes)
        return max(32 << 20, min(cap - (8 << 20), 100 << 20))
    except Exception:
        return 64 << 20


# --------------------------- routed-experts kernel ----------------------------------------
def _routed_expert_kernel(counts_ref, ids_ref, x_ref, wgu_ref, wd_ref, cw_ref,
                          y_ref, acc_ref):
    i = pl.program_id(0)
    e = pl.program_id(1)
    n_steps = pl.num_programs(1)

    @pl.when(e == 0)
    def _init():
        acc_ref[...] = jnp.zeros_like(acc_ref)

    # Skip compute for padded expert steps (no token in this tile picked this expert).
    @pl.when(e < counts_ref[i])
    def _compute():
        x = x_ref[...]                                     # native dtype straight to the MXU
        gu = jnp.dot(x, wgu_ref[0], preferred_element_type=jnp.float32)
        half = gu.shape[-1] // 2
        g = gu[:, :half]
        u = gu[:, half:]
        h = (g * jax.nn.sigmoid(g)) * u                    # SiLU: exp/rcp on EUP, f32
        out = jnp.dot(h.astype(x_ref.dtype), wd_ref[0],
                      preferred_element_type=jnp.float32)
        acc_ref[...] += cw_ref[0, 0] * out                 # (tile_t,1) * (tile_t,H)

    @pl.when(e == n_steps - 1)
    def _store():
        y_ref[...] = acc_ref[...].astype(y_ref.dtype)


# --------------------------- shared-experts kernel ----------------------------------------
def _shared_expert_kernel(x_ref, sgu_ref, sd_ref, y_in_ref, y_ref):
    x = x_ref[...]
    gu = jnp.dot(x, sgu_ref[...], preferred_element_type=jnp.float32)
    half = gu.shape[-1] // 2
    g = gu[:, :half]
    u = gu[:, half:]
    h = (g * jax.nn.sigmoid(g)) * u
    out = jnp.dot(h.astype(x_ref.dtype), sd_ref[...], preferred_element_type=jnp.float32)
    y_ref[...] = (y_in_ref[...].astype(jnp.float32) + out).astype(y_ref.dtype)


# ------------------------------------ wrapper ---------------------------------------------
@functools.partial(jax.jit, static_argnames=("top_k", "norm_topk_prob",
                                              "routed_scaling_factor"))
def deepseek_v2_moe(hidden_states, gate_weight, wg, wu, wd, sg, su, sd,
                    *, top_k, norm_topk_prob, routed_scaling_factor):
    """hidden_states: (B, S, H).

    Weight layout (already transposed for `x @ W`):
      gate_weight: (E, H)     (torch layout)
      wg, wu:      (E, H, I)  routed-expert gate/up projections
      wd:          (E, I, H)  routed-expert down projections
      sg, su:      (H, Is)    shared-expert gate/up    (Is = I * n_shared_experts)
      sd:          (Is, H)    shared-expert down
    """
    orig_shape = hidden_states.shape
    H = orig_shape[-1]
    x = hidden_states.reshape(-1, H)
    T = x.shape[0]
    E, _, I = wg.shape
    Is = sg.shape[1]
    dtype = hidden_states.dtype
    itemsize = jnp.dtype(dtype).itemsize

    # Token tile: dtype-aligned rows (8 f32 / 16 bf16 / 32 int8-fp8), up to 256 for prefill.
    row_align = 8 if itemsize >= 4 else (16 if itemsize == 2 else 32)
    tile_t = min(256, _round_up(T, row_align))
    T_pad = _round_up(T, tile_t)
    n_tiles = T_pad // tile_t
    if T_pad != T:
        x = jnp.pad(x, ((0, T_pad - T), (0, 0)))

    # ---------------- gating (tiny) in XLA: softmax + greedy top-k --------------------------
    logits = x.astype(jnp.float32) @ gate_weight.astype(jnp.float32).T        # (T_pad, E)
    scores = jax.nn.softmax(logits, axis=-1)
    topk_w, topk_idx = jax.lax.top_k(scores, top_k)
    if top_k > 1 and norm_topk_prob:
        topk_w = topk_w / (topk_w.sum(-1, keepdims=True) + 1e-20)
    else:
        topk_w = topk_w * jnp.float32(routed_scaling_factor)

    rows = jnp.arange(T_pad)[:, None]
    cw = jnp.zeros((T_pad, E), jnp.float32).at[rows, topk_idx].add(topk_w)    # dense combine w
    sel = jnp.zeros((T_pad, E), jnp.int32).at[rows, topk_idx].set(1)
    valid = (jnp.arange(T_pad) < T).astype(jnp.int32)
    sel = sel * valid[:, None]
    cw = cw * valid[:, None].astype(jnp.float32)

    # Per-tile active-expert lists (scalar-prefetch metadata).
    E_steps = int(min(E, tile_t * top_k))                      # static upper bound on actives
    tile_sel = sel.reshape(n_tiles, tile_t, E).max(axis=1)                     # (n_tiles, E)
    counts = tile_sel.sum(axis=-1).astype(jnp.int32)                           # (n_tiles,)
    order = jnp.argsort(1 - tile_sel, axis=-1).astype(jnp.int32)               # actives first
    ids2d = order[:, :E_steps]
    step = jnp.arange(E_steps)[None, :]
    last_pos = jnp.maximum(counts - 1, 0)[:, None]
    last_id = jnp.take_along_axis(ids2d, last_pos, axis=1)
    # Padded steps repeat the last active id so their block index is unchanged -> DMA skipped.
    ids2d = jnp.where(step < counts[:, None], ids2d, last_id).astype(jnp.int32)
    ids_flat = ids2d.reshape(-1)                                               # 1D SMEM friendly

    # Per-(tile, step) combine-weight column, gathered in XLA (sublane layout for the kernel).
    cw_t = cw.reshape(n_tiles, tile_t, E).transpose(0, 2, 1)                   # (n_tiles,E,tile_t)
    cwg = jnp.take_along_axis(cw_t, ids2d[:, :, None], axis=1)[..., None]      # (n_tiles,E_steps,tile_t,1)

    # Fused gate+up weights (one matmul / one weight DMA stream per expert).
    wgu = jnp.concatenate([wg, wu], axis=-1)                                   # (E, H, 2I)
    sgu = jnp.concatenate([sg, su], axis=-1)                                   # (H, 2Is)

    vmem_limit = _vmem_limit_bytes()

    cost_routed = pl.CostEstimate(
        flops=int(6 * n_tiles * E_steps * tile_t * H * I + 2 * T_pad * H),
        transcendentals=int(n_tiles * E_steps * tile_t * I),
        bytes_accessed=int((2 * T_pad * H + n_tiles * E_steps * 3 * H * I) * itemsize
                           + n_tiles * E_steps * tile_t * 4),
    )
    cost_shared = pl.CostEstimate(
        flops=int(6 * T_pad * H * Is),
        transcendentals=int(T_pad * Is),
        bytes_accessed=int((3 * T_pad * H + 3 * H * Is) * itemsize),
    )

    # ------------------------------ routed experts -----------------------------------------
    y_routed = pl.pallas_call(
        _routed_expert_kernel,
        out_shape=jax.ShapeDtypeStruct((T_pad, H), dtype),
        grid_spec=pltpu.PrefetchScalarGridSpec(
            num_scalar_prefetch=2,                        # counts, ids_flat -> SMEM
            grid=(n_tiles, E_steps),
            in_specs=[
                pl.BlockSpec((tile_t, H), lambda i, e, cnt, ids: (i, 0)),          # x tile
                pl.BlockSpec((1, H, 2 * I),
                             lambda i, e, cnt, ids: (ids[i * E_steps + e], 0, 0)),  # Wgu[e]
                pl.BlockSpec((1, I, H),
                             lambda i, e, cnt, ids: (ids[i * E_steps + e], 0, 0)),  # Wd[e]
                pl.BlockSpec((1, 1, tile_t, 1), lambda i, e, cnt, ids: (i, e, 0, 0)),  # weights
            ],
            out_specs=pl.BlockSpec((tile_t, H), lambda i, e, cnt, ids: (i, 0)),
            scratch_shapes=[pltpu.VMEM((tile_t, H), jnp.float32)],   # f32 accumulator
        ),
        compiler_params=pltpu.CompilerParams(
            dimension_semantics=("parallel", "arbitrary"),
            vmem_limit_bytes=vmem_limit,
        ),
        cost_estimate=cost_routed,
    )(counts, ids_flat, x, wgu, wd, cwg)

    # ------------------------------ shared experts ------------------------------------------
    # Kept out of the routed kernel so its resident weights do not eat routed-kernel VMEM;
    # accumulates into the routed output in place (input_output_aliases).
    y = pl.pallas_call(
        _shared_expert_kernel,
        out_shape=jax.ShapeDtypeStruct((T_pad, H), dtype),
        grid_spec=pltpu.PrefetchScalarGridSpec(
            num_scalar_prefetch=0,
            grid=(n_tiles,),
            in_specs=[
                pl.BlockSpec((tile_t, H), lambda i: (i, 0)),
                pl.BlockSpec((H, 2 * Is), lambda i: (0, 0)),      # resident shared gate+up
                pl.BlockSpec((Is, H), lambda i: (0, 0)),          # resident shared down
                pl.BlockSpec((tile_t, H), lambda i: (i, 0)),      # routed output (aliased)
            ],
            out_specs=pl.BlockSpec((tile_t, H), lambda i: (i, 0)),
        ),
        compiler_params=pltpu.CompilerParams(
            dimension_semantics=("parallel",),
            vmem_limit_bytes=vmem_limit,
        ),
        cost_estimate=cost_shared,
        input_output_aliases={3: 0},
    )(x, sgu, sd, y_routed)

    return y[:T].reshape(orig_shape)


# ------------------------------ pure-JAX reference ----------------------------------------
def _reference_moe(x3d, gate_weight, wg, wu, wd, sg, su, sd,
                   top_k, norm_topk_prob, routed_scaling_factor):
    orig_shape = x3d.shape
    H = orig_shape[-1]
    x = x3d.reshape(-1, H).astype(jnp.float32)
    E = gate_weight.shape[0]

    logits = x @ gate_weight.astype(jnp.float32).T
    scores = jax.nn.softmax(logits, axis=-1)
    topk_w, topk_idx = jax.lax.top_k(scores, top_k)
    if top_k > 1 and norm_topk_prob:
        topk_w = topk_w / (topk_w.sum(-1, keepdims=True) + 1e-20)
    else:
        topk_w = topk_w * routed_scaling_factor

    cw = jnp.zeros((x.shape[0], E), jnp.float32)
    cw = cw.at[jnp.arange(x.shape[0])[:, None], topk_idx].add(topk_w)

    def mlp(xx, g, u, d):
        return (jax.nn.silu(xx @ g.astype(jnp.float32)) * (xx @ u.astype(jnp.float32))) \
               @ d.astype(jnp.float32)

    y = jnp.zeros_like(x)
    for e in range(E):
        y = y + cw[:, e:e + 1] * mlp(x, wg[e], wu[e], wd[e])
    y = y + mlp(x, sg, su, sd)
    return y.astype(x3d.dtype).reshape(orig_shape)


if __name__ == "__main__":
    key = jax.random.PRNGKey(0)

    # Small config consistent with the module (single device, eval path).
    B, S, H = 2, 8, 128           # batch, seq, hidden_size (lane-dense)
    E, I = 8, 128                 # n_routed_experts, moe_intermediate_size
    top_k = 2                     # num_experts_per_tok
    n_shared = 2                  # n_shared_experts
    Is = I * n_shared
    norm_topk_prob = True
    routed_scaling_factor = 1.0

    keys = jax.random.split(key, 8)
    sH, sI, sIs = 1.0 / math.sqrt(H), 1.0 / math.sqrt(I), 1.0 / math.sqrt(Is)
    x = jax.random.normal(keys[0], (B, S, H), jnp.float32)
    gate_weight = jax.random.normal(keys[1], (E, H), jnp.float32) * sH
    wg = jax.random.normal(keys[2], (E, H, I), jnp.float32) * sH
    wu = jax.random.normal(keys[3], (E, H, I), jnp.float32) * sH
    wd = jax.random.normal(keys[4], (E, I, H), jnp.float32) * sI
    sg = jax.random.normal(keys[5], (H, Is), jnp.float32) * sH
    su = jax.random.normal(keys[6], (H, Is), jnp.float32) * sH
    sd = jax.random.normal(keys[7], (Is, H), jnp.float32) * sIs

    # f32 correctness check against the pure-JAX reference.
    y = deepseek_v2_moe(x, gate_weight, wg, wu, wd, sg, su, sd,
                        top_k=top_k, norm_topk_prob=norm_topk_prob,
                        routed_scaling_factor=routed_scaling_factor)
    y = jax.block_until_ready(y)
    y_ref = _reference_moe(x, gate_weight, wg, wu, wd, sg, su, sd,
                           top_k, norm_topk_prob, routed_scaling_factor)
    assert y.shape == x.shape
    max_err = float(jnp.max(jnp.abs(y - y_ref)))
    assert jnp.allclose(y, y_ref, atol=2e-2, rtol=2e-2), f"max_err={max_err}"

    # bf16 smoke run: exercises the native-dtype MXU path (no in-kernel f32 upcasts).
    to_bf16 = lambda a: a.astype(jnp.bfloat16)
    y_bf16 = deepseek_v2_moe(to_bf16(x), to_bf16(gate_weight), to_bf16(wg), to_bf16(wu),
                             to_bf16(wd), to_bf16(sg), to_bf16(su), to_bf16(sd),
                             top_k=top_k, norm_topk_prob=norm_topk_prob,
                             routed_scaling_factor=routed_scaling_factor)
    jax.block_until_ready(y_bf16)

    print("KERNEL_OK")
</pallas_src>

<mosaic_0001>
module attributes {stable_mosaic.version = 11 : i64} {
  func.func private @main(%arg0: i32) attributes {dimension_semantics = [#tpu.dimension_semantics<core_parallel>], iteration_bounds = array<i64: 2>, tpu.core_type = #tpu.core_type<sc_scalar_subcore>, window_params = []} {
    return
  }
}

module attributes {stable_mosaic.version = 11 : i64} {
  func.func private @main(%arg0: i32) attributes {dimension_semantics = [#tpu.dimension_semantics<core_parallel>], iteration_bounds = array<i64: 2>, tpu.core_type = #tpu.core_type<sc_scalar_subcore>, window_params = []} {
    return
  }
}

module attributes {stable_mosaic.version = 11 : i64} {
  func.func @_shared_expert_kernel(%arg0: i32, %arg1: memref<16x128xf32, #tpu.memory_space<vmem>>, %arg2: memref<128x512xf32, #tpu.memory_space<vmem>>, %arg3: memref<256x128xf32, #tpu.memory_space<vmem>>, %arg4: memref<16x128xf32, #tpu.memory_space<vmem>>, %arg5: memref<16x128xf32, #tpu.memory_space<vmem>>) attributes {dimension_semantics = [#tpu.dimension_semantics<parallel>], iteration_bounds = array<i64: 1>, scalar_prefetch = 0 : i64, scratch_operands = 0 : i64, tpu.core_type = #tpu.core_type<tc>, window_params = [{transform_indices = @transform_0, window_bounds = array<i64: 16, 128>}, {pipeline_mode = #tpu.pipeline_mode<synchronous>, transform_indices = @transform_1, window_bounds = array<i64: 128, 512>}, {pipeline_mode = #tpu.pipeline_mode<synchronous>, transform_indices = @transform_2, window_bounds = array<i64: 256, 128>}, {transform_indices = @transform_3, window_bounds = array<i64: 16, 128>}, {transform_indices = @transform_4, window_bounds = array<i64: 16, 128>}]} {
    %c0 = arith.constant 0 : index
    %c0_0 = arith.constant 0 : index
    %0 = vector.load %arg1[%c0, %c0_0] : memref<16x128xf32, #tpu.memory_space<vmem>>, vector<16x128xf32>
    %c0_1 = arith.constant 0 : index
    %c0_2 = arith.constant 0 : index
    %1 = vector.load %arg2[%c0_1, %c0_2] : memref<128x512xf32, #tpu.memory_space<vmem>>, vector<128x512xf32>
    %cst = arith.constant dense<0.000000e+00> : vector<16x512xf32>
    %2 = tpu.matmul %0, %1, %cst {dimension_numbers = #tpu.dot_dimension_numbers<[1], [0], [0], [1], [0, 0, 1, 1], [], []>} : vector<16x128xf32>, vector<128x512xf32>, vector<16x512xf32> -> vector<16x512xf32>
    %3 = vector.extract_strided_slice %2 {offsets = [0, 0], sizes = [16, 256], strides = [1, 1]} : vector<16x512xf32> to vector<16x256xf32>
    %4 = vector.extract_strided_slice %2 {offsets = [0, 256], sizes = [16, 256], strides = [1, 1]} : vector<16x512xf32> to vector<16x256xf32>
    %5 = arith.negf %3 : vector<16x256xf32>
    %6 = math.exp %5 : vector<16x256xf32>
    %cst_3 = arith.constant 1.000000e+00 : f32
    %7 = vector.broadcast %cst_3 : f32 to vector<16x256xf32>
    %8 = arith.addf %7, %6 : vector<16x256xf32>
    %9 = arith.divf %7, %8 : vector<16x256xf32>
    %10 = arith.mulf %3, %9 : vector<16x256xf32>
    %11 = arith.mulf %10, %4 : vector<16x256xf32>
    %c0_4 = arith.constant 0 : index
    %c0_5 = arith.constant 0 : index
    %12 = vector.load %arg3[%c0_4, %c0_5] : memref<256x128xf32, #tpu.memory_space<vmem>>, vector<256x128xf32>
    %cst_6 = arith.constant dense<0.000000e+00> : vector<16x128xf32>
    %13 = tpu.matmul %11, %12, %cst_6 {dimension_numbers = #tpu.dot_dimension_numbers<[1], [0], [0], [1], [0, 0, 1, 1], [], []>} : vector<16x256xf32>, vector<256x128xf32>, vector<16x128xf32> -> vector<16x128xf32>
    %c0_7 = arith.constant 0 : index
    %c0_8 = arith.constant 0 : index
    %14 = vector.load %arg4[%c0_7, %c0_8] : memref<16x128xf32, #tpu.memory_space<vmem>>, vector<16x128xf32>
    %15 = arith.addf %14, %13 : vector<16x128xf32>
    %c0_9 = arith.constant 0 : index
    %c0_10 = arith.constant 0 : index
    %16 = vector.load %arg5[%c0_9, %c0_10] : memref<16x128xf32, #tpu.memory_space<vmem>>, vector<16x128xf32>
    tpu.vector_store %arg5[%c0_9, %c0_10], %15 {strides = array<i32>} : memref<16x128xf32, #tpu.memory_space<vmem>>, vector<16x128xf32>,
    return
  }
  func.func @transform_0(%arg0: i32) -> (i32, i32) {
    %c0_i32 = arith.constant 0 : i32
    %c0_i32_0 = arith.constant 0 : i32
    return %arg0, %c0_i32 : i32, i32
  }
  func.func @transform_1(%arg0: i32) -> (i32, i32) {
    %c0_i32 = arith.constant 0 : i32
    %c0_i32_0 = arith.constant 0 : i32
    %c0_i32_1 = arith.constant 0 : i32
    return %c0_i32, %c0_i32_0 : i32, i32
  }
  func.func @transform_2(%arg0: i32) -> (i32, i32) {
    %c0_i32 = arith.constant 0 : i32
    %c0_i32_0 = arith.constant 0 : i32
    %c0_i32_1 = arith.constant 0 : i32
    return %c0_i32, %c0_i32_0 : i32, i32
  }
  func.func @transform_3(%arg0: i32) -> (i32, i32) {
    %c0_i32 = arith.constant 0 : i32
    %c0_i32_0 = arith.constant 0 : i32
    return %arg0, %c0_i32 : i32, i32
  }
  func.func @transform_4(%arg0: i32) -> (i32, i32) {
    %c0_i32 = arith.constant 0 : i32
    %c0_i32_0 = arith.constant 0 : i32
    return %arg0, %c0_i32 : i32, i32
  }
}

module attributes {stable_mosaic.version = 11 : i64} {
  func.func @_routed_expert_kernel(%arg0: i32, %arg1: i32, %arg2: memref<1xi32, #tpu.memory_space<smem>>, %arg3: memref<8xi32, #tpu.memory_space<smem>>, %arg4: memref<16x128xf32, #tpu.memory_space<vmem>>, %arg5: memref<1x128x256xf32, #tpu.memory_space<vmem>>, %arg6: memref<1x128x128xf32, #tpu.memory_space<vmem>>, %arg7: memref<1x1x16x1xf32, #tpu.memory_space<vmem>>, %arg8: memref<16x128xf32, #tpu.memory_space<vmem>>, %arg9: memref<16x128xf32, #tpu.memory_space<vmem>>) attributes {dimension_semantics = [#tpu.dimension_semantics<parallel>, #tpu.dimension_semantics<arbitrary>], iteration_bounds = array<i64: 1, 8>, scalar_prefetch = 2 : i64, scratch_operands = 1 : i64, tpu.core_type = #tpu.core_type<tc>, window_params = [{transform_indices = @transform_0, window_bounds = array<i64: 16, 128>}, {transform_indices = @transform_1, window_bounds = array<i64: 1, 128, 256>}, {transform_indices = @transform_2, window_bounds = array<i64: 1, 128, 128>}, {transform_indices = @transform_3, window_bounds = array<i64: 1, 1, 16, 1>}, {transform_indices = @transform_4, window_bounds = array<i64: 16, 128>}]} {
    %c0_i32 = arith.constant 0 : i32
    %0 = arith.cmpi eq, %arg1, %c0_i32 : i32
    %1 = arith.extui %0 : i1 to i32
    %c0_i32_0 = arith.constant 0 : i32
    %2 = arith.cmpi ne, %1, %c0_i32_0 : i32
    scf.if %2 {
      %cst = arith.constant 0.000000e+00 : f32
      %11 = vector.broadcast %cst : f32 to vector<16x128xf32>
      %c0 = arith.constant 0 : index
      %c0_3 = arith.constant 0 : index
      %12 = vector.load %arg9[%c0, %c0_3] : memref<16x128xf32, #tpu.memory_space<vmem>>, vector<16x128xf32>
      tpu.vector_store %arg9[%c0, %c0_3], %11 {strides = array<i32>} : memref<16x128xf32, #tpu.memory_space<vmem>>, vector<16x128xf32>,
    } else {
    }
    %3 = arith.index_cast %arg0 : i32 to index
    %4 = memref.load %arg2[%3] : memref<1xi32, #tpu.memory_space<smem>>
    %5 = arith.cmpi slt, %arg1, %4 : i32
    %6 = arith.extui %5 : i1 to i32
    %c0_i32_1 = arith.constant 0 : i32
    %7 = arith.cmpi ne, %6, %c0_i32_1 : i32
    scf.if %7 {
      %c0 = arith.constant 0 : index
      %c0_3 = arith.constant 0 : index
      %11 = vector.load %arg4[%c0, %c0_3] : memref<16x128xf32, #tpu.memory_space<vmem>>, vector<16x128xf32>
      %c0_4 = arith.constant 0 : index
      %c0_5 = arith.constant 0 : index
      %c0_6 = arith.constant 0 : index
      %12 = vector.load %arg5[%c0_4, %c0_5, %c0_6] : memref<1x128x256xf32, #tpu.memory_space<vmem>>, vector<1x128x256xf32>
      %13 = vector.shape_cast %12 : vector<1x128x256xf32> to vector<128x256xf32>
      %cst = arith.constant dense<0.000000e+00> : vector<16x256xf32>
      %14 = tpu.matmul %11, %13, %cst {dimension_numbers = #tpu.dot_dimension_numbers<[1], [0], [0], [1], [0, 0, 1, 1], [], []>} : vector<16x128xf32>, vector<128x256xf32>, vector<16x256xf32> -> vector<16x256xf32>
      %15 = vector.extract_strided_slice %14 {offsets = [0, 0], sizes = [16, 128], strides = [1, 1]} : vector<16x256xf32> to vector<16x128xf32>
      %16 = vector.extract_strided_slice %14 {offsets = [0, 128], sizes = [16, 128], strides = [1, 1]} : vector<16x256xf32> to vector<16x128xf32>
      %17 = arith.negf %15 : vector<16x128xf32>
      %18 = math.exp %17 : vector<16x128xf32>
      %cst_7 = arith.constant 1.000000e+00 : f32
      %19 = vector.broadcast %cst_7 : f32 to vector<16x128xf32>
      %20 = arith.addf %19, %18 : vector<16x128xf32>
      %21 = arith.divf %19, %20 : vector<16x128xf32>
      %22 = arith.mulf %15, %21 : vector<16x128xf32>
      %23 = arith.mulf %22, %16 : vector<16x128xf32>
      %c0_8 = arith.constant 0 : index
      %c0_9 = arith.constant 0 : index
      %c0_10 = arith.constant 0 : index
      %24 = vector.load %arg6[%c0_8, %c0_9, %c0_10] : memref<1x128x128xf32, #tpu.memory_space<vmem>>, vector<1x128x128xf32>
      %25 = vector.shape_cast %24 : vector<1x128x128xf32> to vector<128x128xf32>
      %cst_11 = arith.constant dense<0.000000e+00> : vector<16x128xf32>
      %26 = tpu.matmul %23, %25, %cst_11 {dimension_numbers = #tpu.dot_dimension_numbers<[1], [0], [0], [1], [0, 0, 1, 1], [], []>} : vector<16x128xf32>, vector<128x128xf32>, vector<16x128xf32> -> vector<16x128xf32>
      %c0_12 = arith.constant 0 : index
      %c0_13 = arith.constant 0 : index
      %27 = vector.load %arg9[%c0_12, %c0_13] : memref<16x128xf32, #tpu.memory_space<vmem>>, vector<16x128xf32>
      %c0_14 = arith.constant 0 : index
      %c0_15 = arith.constant 0 : index
      %c0_16 = arith.constant 0 : index
      %c0_17 = arith.constant 0 : index
      %28 = vector.load %arg7[%c0_14, %c0_15, %c0_16, %c0_17] : memref<1x1x16x1xf32, #tpu.memory_space<vmem>>, vector<1x1x16x1xf32>
      %29 = vector.shape_cast %28 : vector<1x1x16x1xf32> to vector<16x1xf32>
      %30 = vector.broadcast %29 : vector<16x1xf32> to vector<16x128xf32>
      %31 = arith.mulf %30, %26 : vector<16x128xf32>
      %32 = arith.addf %27, %31 : vector<16x128xf32>
      %c0_18 = arith.constant 0 : index
      %c0_19 = arith.constant 0 : index
      %33 = vector.load %arg9[%c0_18, %c0_19] : memref<16x128xf32, #tpu.memory_space<vmem>>, vector<16x128xf32>
      tpu.vector_store %arg9[%c0_18, %c0_19], %32 {strides = array<i32>} : memref<16x128xf32, #tpu.memory_space<vmem>>, vector<16x128xf32>,
    } else {
    }
    %c7_i32 = arith.constant 7 : i32
    %8 = arith.cmpi eq, %arg1, %c7_i32 : i32
    %9 = arith.extui %8 : i1 to i32
    %c0_i32_2 = arith.constant 0 : i32
    %10 = arith.cmpi ne, %9, %c0_i32_2 : i32
    scf.if %10 {
      %c0 = arith.constant 0 : index
      %c0_3 = arith.constant 0 : index
      %11 = vector.load %arg9[%c0, %c0_3] : memref<16x128xf32, #tpu.memory_space<vmem>>, vector<16x128xf32>
      %c0_4 = arith.constant 0 : index
      %c0_5 = arith.constant 0 : index
      %12 = vector.load %arg8[%c0_4, %c0_5] : memref<16x128xf32, #tpu.memory_space<vmem>>, vector<16x128xf32>
      tpu.vector_store %arg8[%c0_4, %c0_5], %11 {strides = array<i32>} : memref<16x128xf32, #tpu.memory_space<vmem>>, vector<16x128xf32>,
    } else {
    }
    return
  }
  func.func @transform_0(%arg0: i32, %arg1: i32, %arg2: memref<1xi32, #tpu.memory_space<smem>>, %arg3: memref<8xi32, #tpu.memory_space<smem>>) -> (i32, i32) {
    %c0_i32 = arith.constant 0 : i32
    %c0_i32_0 = arith.constant 0 : i32
    return %arg0, %c0_i32 : i32, i32
  }
  func.func @transform_1(%arg0: i32, %arg1: i32, %arg2: memref<1xi32, #tpu.memory_space<smem>>, %arg3: memref<8xi32, #tpu.memory_space<smem>>) -> (i32, i32, i32) {
    %c8_i32 = arith.constant 8 : i32
    %0 = arith.muli %arg0, %c8_i32 : i32
    %1 = arith.addi %0, %arg1 : i32
    %2 = arith.index_cast %1 : i32 to index
    %3 = memref.load %arg3[%2] : memref<8xi32, #tpu.memory_space<smem>>
    %c0_i32 = arith.constant 0 : i32
    %c0_i32_0 = arith.constant 0 : i32
    %c0_i32_1 = arith.constant 0 : i32
    return %3, %c0_i32, %c0_i32_0 : i32, i32, i32
  }
  func.func @transform_2(%arg0: i32, %arg1: i32, %arg2: memref<1xi32, #tpu.memory_space<smem>>, %arg3: memref<8xi32, #tpu.memory_space<smem>>) -> (i32, i32, i32) {
    %c8_i32 = arith.constant 8 : i32
    %0 = arith.muli %arg0, %c8_i32 : i32
    %1 = arith.addi %0, %arg1 : i32
    %2 = arith.index_cast %1 : i32 to index
    %3 = memref.load %arg3[%2] : memref<8xi32, #tpu.memory_space<smem>>
    %c0_i32 = arith.constant 0 : i32
    %c0_i32_0 = arith.constant 0 : i32
    %c0_i32_1 = arith.constant 0 : i32
    return %3, %c0_i32, %c0_i32_0 : i32, i32, i32
  }
  func.func @transform_3(%arg0: i32, %arg1: i32, %arg2: memref<1xi32, #tpu.memory_space<smem>>, %arg3: memref<8xi32, #tpu.memory_space<smem>>) -> (i32, i32, i32, i32) {
    %c0_i32 = arith.constant 0 : i32
    %c0_i32_0 = arith.constant 0 : i32
    %c0_i32_1 = arith.constant 0 : i32
    return %arg0, %arg1, %c0_i32, %c0_i32_0 : i32, i32, i32, i32
  }
  func.func @transform_4(%arg0: i32, %arg1: i32, %arg2: memref<1xi32, #tpu.memory_space<smem>>, %arg3: memref<8xi32, #tpu.memory_space<smem>>) -> (i32, i32) {
    %c0_i32 = arith.constant 0 : i32
    %c0_i32_0 = arith.constant 0 : i32
    return %arg0, %c0_i32 : i32, i32
  }
}

</mosaic_0001>

<bundles_post_ra>
// kernel: deepseek_v2_moe.3
= control target key start
LH: loop header
LB: loop body
LE: loop exit
PB: predicated region body
PF: predicated region fallthrough
CT: control target
= control target key end

     0   :  { %v477_v3 = vmov 0.0   ;;  %s813_s1 = inlined_call_operand.vmem [shape: f32[128,512], index: 1, kind: input, shape index: {}]   ;;  %s814_s0 = inlined_call_operand.vmem [shape: f32[16,128], index: 0, kind: input, shape index: {}]   ;;  %s815_s2 = inlined_call_operand.vmem [shape: f32[256,128], index: 2, kind: input, shape index: {}]   ;;  %s816_s3 = inlined_call_operand.vmem [shape: f32[16,128], index: 3, kind: input, shape index: {}, may-alias: {3,4}]   ;;  %s817_s4 = inlined_call_operand.vmem [shape: f32[16,128], index: 4, kind: output, shape index: {}, may-alias: {3,4}]  }
   0x1   :  { %v80_v0 = vld [vmem:[%s813_s1 + $0x1e8] sm:$0xff]  ;;  %v79_v1 = vld [vmem:[%s813_s1 + $0x1e0] sm:$0xff]  ;;  %147 = vmatprep.mubr.f32.mxu0 %v477_v3  ;;  %224 = vmatprep.mubr.f32.mxu1 %v477_v3  ;;  %v82_v15 = vld [vmem:[%s813_s1 + $0x1f8] sm:$0xff] }
   0x2   :  { %v76_v2 = vld [vmem:[%s813_s1 + $0x1c8] sm:$0xff]  ;;  %83 = vmatprep.subr.mxu0 %v80_v0  ;;  %v75_v4 = vld [vmem:[%s813_s1 + $0x1c0] sm:$0xff]  ;;  %v81_v16 = vld [vmem:[%s813_s1 + $0x1f0] sm:$0xff]  ;;  %160 = vmatprep.subr.mxu1 %v82_v15 }
   0x3   :  { %84 = vmatpush1.msra.mxu0 %v79_v1  ;;  %v72_v5 = vld [vmem:[%s813_s1 + $0x1a8] sm:$0xff]  ;;  %v71_v6 = vld [vmem:[%s813_s1 + $0x1a0] sm:$0xff]  ;;  %v78_v17 = vld [vmem:[%s813_s1 + $0x1d8] sm:$0xff]  ;;  %161 = vmatpush1.msra.mxu1 %v81_v16 }
   0x4   :  { %85 = vmatprep.subr.mxu0 %v76_v2  ;;  %v68_v7 = vld [vmem:[%s813_s1 + $0x188] sm:$0xff]  ;;  %v67_v8 = vld [vmem:[%s813_s1 + $0x180] sm:$0xff]  ;;  %v77_v19 = vld [vmem:[%s813_s1 + $0x1d0] sm:$0xff]  ;;  %162 = vmatprep.subr.mxu1 %v78_v17 }
   0x5   :  { %86 = vmatpush1.msra.mxu0 %v75_v4  ;;  %v64_v9 = vld [vmem:[%s813_s1 + $0x168] sm:$0xff]  ;;  %v63_v10 = vld [vmem:[%s813_s1 + $0x160] sm:$0xff]  ;;  %v74_v21 = vld [vmem:[%s813_s1 + $0x1b8] sm:$0xff]  ;;  %163 = vmatpush1.msra.mxu1 %v77_v19 }
   0x6   :  { %87 = vmatprep.subr.mxu0 %v72_v5  ;;  %v60_v11 = vld [vmem:[%s813_s1 + $0x148] sm:$0xff]  ;;  %v59_v12 = vld [vmem:[%s813_s1 + $0x140] sm:$0xff]  ;;  %v73_v23 = vld [vmem:[%s813_s1 + $0x1b0] sm:$0xff]  ;;  %164 = vmatprep.subr.mxu1 %v74_v21 }
   0x7   :  { %88 = vmatpush1.msra.mxu0 %v71_v6  ;;  %v56_v13 = vld [vmem:[%s813_s1 + $0x128] sm:$0xff]  ;;  %v55_v14 = vld [vmem:[%s813_s1 + $0x120] sm:$0xff]  ;;  %v70_v25 = vld [vmem:[%s813_s1 + $0x198] sm:$0xff]  ;;  %165 = vmatpush1.msra.mxu1 %v73_v23 }
   0x8   :  { %89 = vmatprep.subr.mxu0 %v68_v7  ;;  %v52_v18 = vld [vmem:[%s813_s1 + $0x108] sm:$0xff]  ;;  %v51_v20 = vld [vmem:[%s813_s1 + $0x100] sm:$0xff]  ;;  %v69_v27 = vld [vmem:[%s813_s1 + $0x190] sm:$0xff]  ;;  %166 = vmatprep.subr.mxu1 %v70_v25 }
   0x9   :  { %90 = vmatpush1.msra.mxu0 %v67_v8  ;;  %v48_v22 = vld [vmem:[%s813_s1 + $0xe8] sm:$0xff]  ;;  %v47_v24 = vld [vmem:[%s813_s1 + $0xe0] sm:$0xff]  ;;  %v66_v29 = vld [vmem:[%s813_s1 + $0x178] sm:$0xff]  ;;  %167 = vmatpush1.msra.mxu1 %v69_v27 }
   0xa   :  { %91 = vmatprep.subr.mxu0 %v64_v9  ;;  %v44_v26 = vld [vmem:[%s813_s1 + $0xc8] sm:$0xff]  ;;  %v43_v28 = vld [vmem:[%s813_s1 + $0xc0] sm:$0xff]  ;;  %v65_v31 = vld [vmem:[%s813_s1 + $0x170] sm:$0xff]  ;;  %168 = vmatprep.subr.mxu1 %v66_v29 }
   0xb   :  { %92 = vmatpush1.msra.mxu0 %v63_v10  ;;  %v40_v30 = vld [vmem:[%s813_s1 + $0xa8] sm:$0xff]  ;;  %v39_v32 = vld [vmem:[%s813_s1 + $0xa0] sm:$0xff]  ;;  %v62_v33 = vld [vmem:[%s813_s1 + $0x158] sm:$0xff]  ;;  %169 = vmatpush1.msra.mxu1 %v65_v31 }
   0xc   :  { %93 = vmatprep.subr.mxu0 %v60_v11  ;;  %v36_v34 = vld [vmem:[%s813_s1 + $0x88] sm:$0xff]  ;;  %v61_v35 = vld [vmem:[%s813_s1 + $0x150] sm:$0xff]  ;;  %v35_v36 = vld [vmem:[%s813_s1 + $0x80] sm:$0xff]  ;;  %170 = vmatprep.subr.mxu1 %v62_v33 }
   0xd   :  { %94 = vmatpush1.msra.mxu0 %v59_v12  ;;  %v58_v37 = vld [vmem:[%s813_s1 + $0x138] sm:$0xff]  ;;  %v32_v38 = vld [vmem:[%s813_s1 + $0x68] sm:$0xff]  ;;  %v57_v39 = vld [vmem:[%s813_s1 + $0x130] sm:$0xff]  ;;  %171 = vmatpush1.msra.mxu1 %v61_v35 }
   0xe   :  { %95 = vmatprep.subr.mxu0 %v56_v13  ;;  %v31_v40 = vld [vmem:[%s813_s1 + $0x60] sm:$0xff]  ;;  %v54_v41 = vld [vmem:[%s813_s1 + $0x118] sm:$0xff]  ;;  %v28_v42 = vld [vmem:[%s813_s1 + $0x48] sm:$0xff]  ;;  %172 = vmatprep.subr.mxu1 %v58_v37 }
   0xf   :  { %96 = vmatpush1.msra.mxu0 %v55_v14  ;;  %v53_v43 = vld [vmem:[%s813_s1 + $0x110] sm:$0xff]  ;;  %v27_v44 = vld [vmem:[%s813_s1 + $0x40] sm:$0xff]  ;;  %173 = vmatpush1.msra.mxu1 %v57_v39  ;;  %v50_v45 = vld [vmem:[%s813_s1 + $0xf8] sm:$0xff] }
  0x10   :  { %97 = vmatprep.subr.mxu0 %v52_v18  ;;  %v24_v46 = vld [vmem:[%s813_s1 + $0x28] sm:$0xff]  ;;  %174 = vmatprep.subr.mxu1 %v54_v41  ;;  %v49_v47 = vld [vmem:[%s813_s1 + $0xf0] sm:$0xff]  ;;  %v23_v48 = vld [vmem:[%s813_s1 + $0x20] sm:$0xff] }
  0x11   :  { %98 = vmatpush1.msra.mxu0 %v51_v20  ;;  %175 = vmatpush1.msra.mxu1 %v53_v43  ;;  %v46_v49 = vld [vmem:[%s813_s1 + $0xd8] sm:$0xff]  ;;  %v20_v50 = vld [vmem:[%s813_s1 + $0x8] sm:$0xff]  ;;  %v45_v51 = vld [vmem:[%s813_s1 + $0xd0] sm:$0xff] }
  0x12   :  { %99 = vmatprep.subr.mxu0 %v48_v22  ;;  %176 = vmatprep.subr.mxu1 %v50_v45  ;;  %v19_v52 = vld [vmem:[%s813_s1] sm:$0xff]  ;;  %v42_v53 = vld [vmem:[%s813_s1 + $0xb8] sm:$0xff]  ;;  %v41_v55 = vld [vmem:[%s813_s1 + $0xb0] sm:$0xff] }
  0x13   :  { %100 = vmatpush1.msra.mxu0 %v47_v24  ;;  %177 = vmatpush1.msra.mxu1 %v49_v47  ;;  %v17_v54 = vld [vmem:[%s814_s0] sm:$0xff]  ;;  %v38_v56 = vld [vmem:[%s813_s1 + $0x98] sm:$0xff]  ;;  %v37_v57 = vld [vmem:[%s813_s1 + $0x90] sm:$0xff] }
  0x14   :  { %101 = vmatprep.subr.mxu0 %v44_v26  ;;  %178 = vmatprep.subr.mxu1 %v46_v49  ;;  %v34_v58 = vld [vmem:[%s813_s1 + $0x78] sm:$0xff]  ;;  %v18_v59 = vld [vmem:[%s814_s0 + $0x8] sm:$0xff]  ;;  %v33_v60 = vld [vmem:[%s813_s1 + $0x70] sm:$0xff] }
  0x15   :  { %102 = vmatpush1.msra.mxu0 %v43_v28  ;;  %179 = vmatpush1.msra.mxu1 %v45_v51  ;;  %v30_v61 = vld [vmem:[%s813_s1 + $0x58] sm:$0xff]  ;;  %v29_v62 = vld [vmem:[%s813_s1 + $0x50] sm:$0xff]  ;;  %v298_v7 = vld [vmem:[%s815_s2 + $0xe8] sm:$0xff] }
  0x16   :  { %103 = vmatprep.subr.mxu0 %v40_v30  ;;  %180 = vmatprep.subr.mxu1 %v42_v53  ;;  %v26_v63 = vld [vmem:[%s813_s1 + $0x38] sm:$0xff]  ;;  %v25_v0 = vld [vmem:[%s813_s1 + $0x30] sm:$0xff]  ;;  %v282_v8 = vld [vmem:[%s815_s2 + $0x68] sm:$0xff] }
  0x17   :  { %104 = vmatpush1.msra.mxu0 %v39_v32  ;;  %181 = vmatpush1.msra.mxu1 %v41_v55  ;;  %v22_v1 = vld [vmem:[%s813_s1 + $0x18] sm:$0xff]  ;;  %v21_v2 = vld [vmem:[%s813_s1 + $0x10] sm:$0xff]  ;;  %v297_v9 = vld [vmem:[%s815_s2 + $0xe0] sm:$0xff] }
  0x18   :  { %105 = vmatprep.subr.mxu0 %v36_v34  ;;  %182 = vmatprep.subr.mxu1 %v38_v56  ;;  %v300_v4 = vld [vmem:[%s815_s2 + $0xf8] sm:$0xff]  ;;  %v299_v6 = vld [vmem:[%s815_s2 + $0xf0] sm:$0xff]  ;;  %v281_v10 = vld [vmem:[%s815_s2 + $0x60] sm:$0xff] }
  0x19   :  { %106 = vmatpush1.msra.mxu0 %v35_v36  ;;  %183 = vmatpush1.msra.mxu1 %v37_v57  ;;  %v284_v5 = vld [vmem:[%s815_s2 + $0x78] sm:$0xff]  ;;  %v295_v13 = vld [vmem:[%s815_s2 + $0xd0] sm:$0xff]  ;;  %v294_v15 = vld [vmem:[%s815_s2 + $0xc8] sm:$0xff] }
  0x1a   :  { %107 = vmatprep.subr.mxu0 %v32_v38  ;;  %184 = vmatprep.subr.mxu1 %v34_v58  ;;  %v296_v11 = vld [vmem:[%s815_s2 + $0xd8] sm:$0xff]  ;;  %v279_v14 = vld [vmem:[%s815_s2 + $0x50] sm:$0xff]  ;;  %v278_v16 = vld [vmem:[%s815_s2 + $0x48] sm:$0xff] }
  0x1b   :  { %108 = vmatpush1.msra.mxu0 %v31_v40  ;;  %185 = vmatpush1.msra.mxu1 %v33_v60  ;;  %v280_v12 = vld [vmem:[%s815_s2 + $0x58] sm:$0xff]  ;;  %v293_v17 = vld [vmem:[%s815_s2 + $0xc0] sm:$0xff]  ;;  %v291_v21 = vld [vmem:[%s815_s2 + $0xb0] sm:$0xff] }
  0x1c   :  { %109 = vmatprep.subr.mxu0 %v28_v42  ;;  %186 = vmatprep.subr.mxu1 %v30_v61  ;;  %v277_v18 = vld [vmem:[%s815_s2 + $0x40] sm:$0xff]  ;;  %v292_v19 = vld [vmem:[%s815_s2 + $0xb8] sm:$0xff]  ;;  %v275_v22 = vld [vmem:[%s815_s2 + $0x30] sm:$0xff] }
  0x1d   :  { %110 = vmatpush1.msra.mxu0 %v27_v44  ;;  %187 = vmatpush1.msra.mxu1 %v29_v62  ;;  %v276_v20 = vld [vmem:[%s815_s2 + $0x38] sm:$0xff]  ;;  %v290_v23 = vld [vmem:[%s815_s2 + $0xa8] sm:$0xff]  ;;  %v289_v25 = vld [vmem:[%s815_s2 + $0xa0] sm:$0xff] }
  0x1e   :  { %111 = vmatprep.subr.mxu0 %v24_v46  ;;  %188 = vmatprep.subr.mxu1 %v26_v63  ;;  %v274_v24 = vld [vmem:[%s815_s2 + $0x28] sm:$0xff]  ;;  %v273_v26 = vld [vmem:[%s815_s2 + $0x20] sm:$0xff]  ;;  %v288_v27 = vld [vmem:[%s815_s2 + $0x98] sm:$0xff] }
  0x1f   :  { %112 = vmatpush1.msra.mxu0 %v23_v48  ;;  %189 = vmatpush1.msra.mxu1 %v25_v0  ;;  %v272_v28 = vld [vmem:[%s815_s2 + $0x18] sm:$0xff]  ;;  %v287_v29 = vld [vmem:[%s815_s2 + $0x90] sm:$0xff]  ;;  %v286_v31 = vld [vmem:[%s815_s2 + $0x88] sm:$0xff] }
  0x20   :  { %113 = vmatprep.subr.mxu0 %v20_v50  ;;  %190 = vmatprep.subr.mxu1 %v22_v1  ;;  %v271_v30 = vld [vmem:[%s815_s2 + $0x10] sm:$0xff]  ;;  %v270_v32 = vld [vmem:[%s815_s2 + $0x8] sm:$0xff]  ;;  %v285_v33 = vld [vmem:[%s815_s2 + $0x80] sm:$0xff] }
  0x21   :  { %114 = vmatpush1.msra.mxu0 %v19_v52  ;;  %191 = vmatpush1.msra.mxu1 %v21_v2  ;;  %v269_v34 = vld [vmem:[%s815_s2] sm:$0xff] }
  0x22   :  { %148 = vmatmul.mubr.f32.vlgmr.msra.gmra.mxu0 %v17_v54  ;;  %225 = vmatmul.mubr.f32.vlgmr.msra.gmra.mxu1 %v17_v54 }
  0x23   :  { %153 = vmatprep.mubr.f32.mxu0 %v477_v3  ;;  %230 = vmatprep.mubr.f32.mxu1 %v477_v3  ;;  %v283_v3 = vld [vmem:[%s815_s2 + $0x70] sm:$0xff] }
  0x24   :  { %390 = vmatprep.subr.mxu0 %v300_v4  ;;  %428 = vmatprep.subr.mxu1 %v300_v4 }
  0x25   :  { %391 = vmatpush3.msra.mxu0 %v284_v5  ;;  %444 = vmatpush3.msra.mxu1 %v284_v5 }
  0x26   :  { %154 = vmatmul.mubr.f32.gmra.mxu0 %v18_v59  ;;  %231 = vmatmul.mubr.f32.gmra.mxu1 %v18_v59 }
  0x27   :  { %392 = vmatprep.subr.mxu0 %v299_v6  ;;  %429 = vmatprep.subr.mxu1 %v299_v6  ;;  %v376_v6 = vld [vmem:[%s816_s3] sm:$0xff] }
  0x28   :  { %393 = vmatpush3.msra.mxu0 %v283_v3  ;;  %445 = vmatpush3.msra.mxu1 %v283_v3 }
  0x29   :  { %394 = vmatprep.subr.mxu0 %v298_v7  ;;  %430 = vmatprep.subr.mxu1 %v298_v7 }
  0x2a   :  { %395 = vmatpush3.msra.mxu0 %v282_v8  ;;  %446 = vmatpush3.msra.mxu1 %v282_v8 }
  0x2b   :  { %396 = vmatprep.subr.mxu0 %v297_v9  ;;  %431 = vmatprep.subr.mxu1 %v297_v9 }
  0x2c   :  { %397 = vmatpush3.msra.mxu0 %v281_v10  ;;  %447 = vmatpush3.msra.mxu1 %v281_v10  ;;  %v377_v10 = vld [vmem:[%s816_s3 + $0x8] sm:$0xff] }
  0x2d   :  { %398 = vmatprep.subr.mxu0 %v296_v11  ;;  %432 = vmatprep.subr.mxu1 %v296_v11 }
  0x2e   :  { %399 = vmatpush3.msra.mxu0 %v280_v12  ;;  %448 = vmatpush3.msra.mxu1 %v280_v12 }
  0x2f   :  { %400 = vmatprep.subr.mxu0 %v295_v13  ;;  %433 = vmatprep.subr.mxu1 %v295_v13 }
  0x30   :  { %401 = vmatpush3.msra.mxu0 %v279_v14  ;;  %449 = vmatpush3.msra.mxu1 %v279_v14 }
  0x31   :  { %402 = vmatprep.subr.mxu0 %v294_v15  ;;  %434 = vmatprep.subr.mxu1 %v294_v15 }
  0x32   :  { %403 = vmatpush3.msra.mxu0 %v278_v16  ;;  %450 = vmatpush3.msra.mxu1 %v278_v16 }
  0x33   :  { %404 = vmatprep.subr.mxu0 %v293_v17  ;;  %435 = vmatprep.subr.mxu1 %v293_v17 }
  0x34   :  { %405 = vmatpush3.msra.mxu0 %v277_v18  ;;  %451 = vmatpush3.msra.mxu1 %v277_v18 }
  0x35   :  { %406 = vmatprep.subr.mxu0 %v292_v19  ;;  %436 = vmatprep.subr.mxu1 %v292_v19 }
  0x36   :  { %407 = vmatpush3.msra.mxu0 %v276_v20  ;;  %452 = vmatpush3.msra.mxu1 %v276_v20 }
  0x37   :  { %408 = vmatprep.subr.mxu0 %v291_v21  ;;  %437 = vmatprep.subr.mxu1 %v291_v21 }
  0x38   :  { %409 = vmatpush3.msra.mxu0 %v275_v22  ;;  %453 = vmatpush3.msra.mxu1 %v275_v22 }
  0x39   :  { %410 = vmatprep.subr.mxu0 %v290_v23  ;;  %438 = vmatprep.subr.mxu1 %v290_v23 }
  0x3a   :  { %411 = vmatpush3.msra.mxu0 %v274_v24  ;;  %454 = vmatpush3.msra.mxu1 %v274_v24 }
  0x3b   :  { %412 = vmatprep.subr.mxu0 %v289_v25  ;;  %439 = vmatprep.subr.mxu1 %v289_v25 }
  0x3c   :  { %413 = vmatpush3.msra.mxu0 %v273_v26  ;;  %455 = vmatpush3.msra.mxu1 %v273_v26 }
  0x3d   :  { %414 = vmatprep.subr.mxu0 %v288_v27  ;;  %440 = vmatprep.subr.mxu1 %v288_v27 }
  0x3e   :  { %415 = vmatpush3.msra.mxu0 %v272_v28  ;;  %456 = vmatpush3.msra.mxu1 %v272_v28 }
  0x3f   :  { %416 = vmatprep.subr.mxu0 %v287_v29  ;;  %441 = vmatprep.subr.mxu1 %v287_v29 }
  0x40   :  { %417 = vmatpush3.msra.mxu0 %v271_v30  ;;  %457 = vmatpush3.msra.mxu1 %v271_v30 }
  0x41   :  { %418 = vmatprep.subr.mxu0 %v286_v31  ;;  %442 = vmatprep.subr.mxu1 %v286_v31 }
  0x42   :  { %419 = vmatpush3.msra.mxu0 %v270_v32  ;;  %458 = vmatpush3.msra.mxu1 %v270_v32 }
  0x43   :  { %420 = vmatprep.subr.mxu0 %v285_v33  ;;  %443 = vmatprep.subr.mxu1 %v285_v33 }
  0x44   :  { %421 = vmatpush3.msra.mxu0 %v269_v34  ;;  %459 = vmatpush3.msra.mxu1 %v269_v34 }
  0xe2   :  { %v149_v35 = vpop.f32.mrf.mxu0  ;;  %v226_v51 = vpop.f32.mrf.mxu1 }
  0xe3   :  { %v386_v36 = vmul.f32 -1.442695, %v149_v35 }
  0xe4   :  { %v151_v37 = vpop.f32.mrf.mxu0  ;;  %v228_v53 = vpop.f32.mrf.mxu1 }
  0xe5   :  { %461 = vpow2.f32 %v386_v36  ;;  %v387_v38 = vmul.f32 -1.442695, %v151_v37 }
  0xe6   :  { %v155_v39 = vpop.f32.mrf.mxu0  ;;  %v232_v58 = vpop.f32.mrf.mxu1 }
  0xe7   :  { %463 = vpow2.f32 %v387_v38  ;;  %v388_v40 = vmul.f32 -1.442695, %v155_v39 }
  0xe8   :  { %v157_v41 = vpop.f32.mrf.mxu0  ;;  %v234_v0 = vpop.f32.mrf.mxu1 }
  0xe9   :  { %465 = vpow2.f32 %v388_v40  ;;  %v389_v42 = vmul.f32 -1.442695, %v157_v41 }
  0xeb   :  { %467 = vpow2.f32 %v389_v42 }
  0xf2   :  { %v462_v43 = vpop.eup %461 }
  0xf3   :  { %v249_v44 = vadd.f32 1.0, %v462_v43 }
  0xf4   :  { %v464_v45 = vpop.eup %463 }
  0xf5   :  { %469 = vrcp.f32 %v249_v44  ;;  %v250_v46 = vadd.f32 1.0, %v464_v45 }
  0xf6   :  { %v466_v47 = vpop.eup %465 }
  0xf7   :  { %471 = vrcp.f32 %v250_v46  ;;  %v251_v48 = vadd.f32 1.0, %v466_v47 }
  0xf8   :  { %v468_v49 = vpop.eup %467 }
  0xf9   :  { %473 = vrcp.f32 %v251_v48  ;;  %v252_v50 = vadd.f32 1.0, %v468_v49 }
  0xfb   :  { %475 = vrcp.f32 %v252_v50 }
 0x102   :  { %v470_v52 = vpop.eup %469 }
 0x103   :  { %v261_v55 = vmul.f32 %v470_v52, %v149_v35 }
 0x104   :  { %v472_v54 = vpop.eup %471 }
 0x105   :  { %v262_v56 = vmul.f32 %v472_v54, %v151_v37  ;;  %v265_v62 = vmul.f32 %v261_v55, %v226_v51 }
 0x106   :  { %v474_v57 = vpop.eup %473 }
 0x107   :  { %v266_v59 = vmul.f32 %v262_v56, %v228_v53  ;;  %v263_v61 = vmul.f32 %v474_v57, %v155_v39 }
 0x108   :  { %v476_v60 = vpop.eup %475 }
 0x109   :  { %v264_v63 = vmul.f32 %v476_v60, %v157_v41  ;;  %365 = vmatprep.mubr.f32.mxu0 %v266_v59  ;;  %v267_v2 = vmul.f32 %v263_v61, %v232_v58 }
 0x10a   :  { %366 = vmatmul.mubr.f32.vlgmr.msra.gmra.mxu0 %v265_v62 }
 0x10b   :  { %v268_v1 = vmul.f32 %v264_v63, %v234_v0 }
 0x10d   :  { %370 = vmatprep.mubr.f32.mxu1 %v268_v1 }
 0x10e   :  { %371 = vmatmul.mubr.f32.vlgmr.msra.gmra.mxu1 %v267_v2 }
 0x1ca   :  { %v422_v4 = vpop.f32.mrf.mxu0 }
 0x1cc   :  { %v423_v5 = vpop.f32.mrf.mxu0 }
 0x1cd   :  { %v424_v3 = vadd.f32 %v423_v5, %v422_v4 }
 0x1ce   :  { %v425_v7 = vpop.f32.mrf.mxu1 }
 0x1cf   :  { %v378_v8 = vadd.f32 %v424_v3, %v376_v6 }
 0x1d0   :  { %v426_v9 = vpop.f32.mrf.mxu1 }
 0x1d1   :  { %380 = vst [vmem:[%s817_s4] sm:$0xff] %v378_v8  ;;  %v427_v11 = vadd.f32 %v426_v9, %v425_v7 }
 0x1d3   :  { %v379_v12 = vadd.f32 %v427_v11, %v377_v10 }
 0x1d5   :  { %381 = vst [vmem:[%s817_s4 + $0x8] sm:$0xff] %v379_v12 }

// kernel: deepseek_v2_moe.2
= control target key start
LH: loop header
LB: loop body
LE: loop exit
PB: predicated region body
PF: predicated region fallthrough
CT: control target
= control target key end

     0   :  { %s1014_s0 = inlined_call_operand.<no memory space> [shape: s32[1], index: 0, kind: input, shape index: {}]   ;;  %s1015_s1 = inlined_call_operand.vmem [shape: s32[8], index: 1, kind: input, shape index: {}]   ;;  %s1016_s2 = inlined_call_operand.vmem [shape: f32[16,128], index: 2, kind: input, shape index: {}]   ;;  %s1017_s3 = inlined_call_operand.vmem [shape: f32[8,128,256], index: 3, kind: input, shape index: {}]   ;;  %s1018_s4 = inlined_call_operand.vmem [shape: f32[8,128,128], index: 4, kind: input, shape index: {}]   ;;  %s1019_s5 = inlined_call_operand.vmem [shape: f32[1,8,16,1], index: 5, kind: input, shape index: {}]   ;;  %s1020_s6 = inlined_call_operand.vmem [shape: f32[16,128], index: 6, kind: output, shape index: {}]  }
   0x1   :  { %11 = sst [smem:[#allocation4]] %s1014_s0  ;;  %s12_s25 = sshll.u32 %s1015_s1, 4  ;;  %s13_s25 = int_to_ptr.vmem [resolvable:$true] %s12_s25 }
   0x2   :  { %s818_s26 = scalar_lea.vmem %s13_s25, 16  ;;  %p823_p1 = scmp.lt.s32.totalorder %s13_s25, %s13_s25 }
   0x3   :  { %p819_p0 = scmp.ne.s32.totalorder %s13_s25, %s818_s26  ;;  %p824_p2 = scmp.lt.s32.totalorder %s818_s26, %s818_s26 }
   0x5   :  { %p825_p3 = por %p824_p2, %p823_p1 }
   0x7   :  { %p826_p4 = pnand %p825_p3, %p819_p0 }
   0x9   :  { %829 = shalt.err (!%p826_p4)  }
   0xa   :  { %s856_s27 = smov [#allocation5]  }
   0xb   :  { %15 = dma.vmem_to_smem %s13_s25, 16, %s856_s27, [#allocation3] }
   0xc   :  { %842 = dma.done.wait [#allocation3], 16 }
   0xd   :  { %843 = vsyncadd [#allocation3], 4294967280 }
   0xe   :  { %17 = sfence }
   0xf   :  { %s901_s28 = smov 0   ;;  %s903_s0 = smov 0  }
  0x10   :  { %s905_s29 = smov 0  }
  0x11 LB: > { %s32_s1 = sadd.s32 1, %s850_s0  ;;  %p709_p5 = scmp.ge.s32.totalorder %s854_s29, 1  ;;  %s854_s29 = sphi %s905_s29, %s23_s29   ;;  %s850_s0 = sphi %s903_s0, %s1022_s0   ;;  %s846_s28 = sphi %s901_s28, %s1021_s28  }
  0x12   : > { %p33_p6 = scmp.ge.s32.totalorder %s32_s1, 8  ;;  %p244_p7 = scmp.lt.s32.totalorder %s854_s29, 9 }
  0x14   : > { %s1024_s1 = smov (%p33_p6, %s32_s1), 0  ;;  %p245_p8 = pnand %p709_p5, %p244_p7 }
  0x15   : > { %s303_s30 = sld [smem:[#allocation5 + %s846_s28]] (!%p245_p8)  ;;  %p325_p9 = scmp.lt.s32.totalorder (!%p245_p8), %s846_s28, 7 }
  0x16   : > { %248 = sbr.rel (%p245_p8) target bundleno = 524 (0x20c), region = 36  ;;  %s314_s7 = sld [smem:[#allocation5 + %s846_s28]] (!%p245_p8) }
  0x17   : > { %p716_p12 = scmp.ne.s32.totalorder (!%p245_p8), %s846_s28, 0 }
  0x1b   : > { %s326_s8 = scalar_select %p325_p9, %s846_s28, 7 }
  0x1c   : > { %p304_p10 = scmp.lt.s32.totalorder %s303_s30, 7  ;;  %p315_p11 = scmp.lt.s32.totalorder %s314_s7, 7 }
  0x1d   : > { %s727_s9 = sshll.u32 %s326_s8, 4  ;;  %341 = sbr.rel (%p716_p12) target bundleno = 36 (0x24), region = 40 }
  0x1e   : > { %s928_s12 = scalar_lea.vmem %s1019_s5, %s727_s9  ;;  %s1026_s30 = smov (!%p304_p10, %s303_s30), 7 }
  0x1f   : > { %s1028_s7 = smov (!%p315_p11, %s314_s7), 7  ;;  %s725_s13 = sshll.u32 %s1026_s30, 8 }
  0x20   : > { %s933_s16 = scalar_lea.vmem %s1017_s3, %s725_s13  ;;  %s726_s17 = sshll.u32 %s1028_s7, 7 }
  0x21   : > { %s938_s20 = scalar_lea.vmem %s1018_s4, %s726_s17 }
  0x22   : > { %v857_v0 = vmov 0.0  }
  0x23   : > { %342 = vst [vmem:[#allocation2] sm:$0xff] %v857_v0  ;;  %343 = vst [vmem:[#allocation2 + $0x8] sm:$0xff] %v857_v0 }
  0x24 PF: > { %s344_s21 = sld [smem:[#allocation4]] }
  0x2a   : > { %p717_p13 = scmp.ge.s32.totalorder %s846_s28, %s344_s21 }
  0x2c   : > { %348 = sbr.rel (%p717_p13) target bundleno = 515 (0x203), region = 44 }
  0x31   : > { %v382_v1 = vld [vmem:[%s933_s16 + $0xf8] sm:$0xff]  ;;  %v381_v2 = vld [vmem:[%s933_s16 + $0xf0] sm:$0xff]  ;;  %v380_v3 = vld [vmem:[%s933_s16 + $0xe8] sm:$0xff]  ;;  %v858_v5 = vmov 0.0   ;;  %v859_v53 = vmov 0  }
  0x32   : > { %383 = vmatprep.subr.mxu0 %v382_v1  ;;  %v379_v4 = vld [vmem:[%s933_s16 + $0xe0] sm:$0xff]  ;;  %447 = vmatprep.mubr.f32.mxu0 %v858_v5  ;;  %v378_v6 = vld [vmem:[%s933_s16 + $0xd8] sm:$0xff]  ;;  %v377_v7 = vld [vmem:[%s933_s16 + $0xd0] sm:$0xff] }
  0x33   : > { %384 = vmatpush1.msra.mxu0 %v381_v2  ;;  %v376_v8 = vld [vmem:[%s933_s16 + $0xc8] sm:$0xff]  ;;  %v375_v9 = vld [vmem:[%s933_s16 + $0xc0] sm:$0xff]  ;;  %v374_v10 = vld [vmem:[%s933_s16 + $0xb8] sm:$0xff]  ;;  %809 = vset.pattern.permute.xlu0 %v859_v53 }
  0x34   : > { %385 = vmatprep.subr.mxu0 %v380_v3  ;;  %v373_v11 = vld [vmem:[%s933_s16 + $0xb0] sm:$0xff]  ;;  %v372_v12 = vld [vmem:[%s933_s16 + $0xa8] sm:$0xff]  ;;  %v371_v13 = vld [vmem:[%s933_s16 + $0xa0] sm:$0xff] }
  0x35   : > { %386 = vmatpush1.msra.mxu0 %v379_v4  ;;  %v370_v14 = vld [vmem:[%s933_s16 + $0x98] sm:$0xff]  ;;  %v369_v15 = vld [vmem:[%s933_s16 + $0x90] sm:$0xff]  ;;  %v368_v16 = vld [vmem:[%s933_s16 + $0x88] sm:$0xff] }
  0x36   : > { %387 = vmatprep.subr.mxu0 %v378_v6  ;;  %v367_v17 = vld [vmem:[%s933_s16 + $0x80] sm:$0xff]  ;;  %v366_v18 = vld [vmem:[%s933_s16 + $0x78] sm:$0xff]  ;;  %v365_v19 = vld [vmem:[%s933_s16 + $0x70] sm:$0xff] }
  0x37   : > { %388 = vmatpush1.msra.mxu0 %v377_v7  ;;  %v364_v20 = vld [vmem:[%s933_s16 + $0x68] sm:$0xff]  ;;  %v363_v21 = vld [vmem:[%s933_s16 + $0x60] sm:$0xff]  ;;  %v362_v22 = vld [vmem:[%s933_s16 + $0x58] sm:$0xff] }
  0x38   : > { %389 = vmatprep.subr.mxu0 %v376_v8  ;;  %v361_v23 = vld [vmem:[%s933_s16 + $0x50] sm:$0xff]  ;;  %v360_v24 = vld [vmem:[%s933_s16 + $0x48] sm:$0xff]  ;;  %v359_v25 = vld [vmem:[%s933_s16 + $0x40] sm:$0xff] }
  0x39   : > { %390 = vmatpush1.msra.mxu0 %v375_v9  ;;  %v358_v26 = vld [vmem:[%s933_s16 + $0x38] sm:$0xff]  ;;  %v357_v27 = vld [vmem:[%s933_s16 + $0x30] sm:$0xff]  ;;  %v356_v28 = vld [vmem:[%s933_s16 + $0x28] sm:$0xff] }
  0x3a   : > { %391 = vmatprep.subr.mxu0 %v374_v10  ;;  %v355_v29 = vld [vmem:[%s933_s16 + $0x20] sm:$0xff]  ;;  %v354_v30 = vld [vmem:[%s933_s16 + $0x18] sm:$0xff]  ;;  %v353_v31 = vld [vmem:[%s933_s16 + $0x10] sm:$0xff] }
  0x3b   : > { %392 = vmatpush1.msra.mxu0 %v373_v11  ;;  %v352_v32 = vld [vmem:[%s933_s16 + $0x8] sm:$0xff]  ;;  %v351_v33 = vld [vmem:[%s933_s16] sm:$0xff]  ;;  %v491_v36 = vld [vmem:[%s938_s20 + $0x78] sm:$0xff] }
  0x3c   : > { %393 = vmatprep.subr.mxu0 %v372_v12  ;;  %v349_v34 = vld [vmem:[%s1016_s2] sm:$0xff]  ;;  %v350_v35 = vld [vmem:[%s1016_s2 + $0x8] sm:$0xff]  ;;  %746 = vmatprep.subr.mxu1 %v491_v36  ;;  %v490_v37 = vld [vmem:[%s938_s20 + $0x70] sm:$0xff] }
  0x3d   : > { %394 = vmatpush1.msra.mxu0 %v371_v13  ;;  %747 = vmatpush3.msra.mxu1 %v491_v36  ;;  %v489_v38 = vld [vmem:[%s938_s20 + $0x68] sm:$0xff]  ;;  %v488_v39 = vld [vmem:[%s938_s20 + $0x60] sm:$0xff]  ;;  %v487_v40 = vld [vmem:[%s938_s20 + $0x58] sm:$0xff] }
  0x3e   : > { %395 = vmatprep.subr.mxu0 %v370_v14  ;;  %748 = vmatprep.subr.mxu1 %v490_v37  ;;  %v486_v41 = vld [vmem:[%s938_s20 + $0x50] sm:$0xff]  ;;  %v485_v42 = vld [vmem:[%s938_s20 + $0x48] sm:$0xff]  ;;  %v484_v43 = vld [vmem:[%s938_s20 + $0x40] sm:$0xff] }
  0x3f   : > { %396 = vmatpush1.msra.mxu0 %v369_v15  ;;  %749 = vmatpush3.msra.mxu1 %v490_v37  ;;  %v483_v44 = vld [vmem:[%s938_s20 + $0x38] sm:$0xff]  ;;  %v482_v45 = vld [vmem:[%s938_s20 + $0x30] sm:$0xff]  ;;  %v481_v46 = vld [vmem:[%s938_s20 + $0x28] sm:$0xff] }
  0x40   : > { %397 = vmatprep.subr.mxu0 %v368_v16  ;;  %750 = vmatprep.subr.mxu1 %v489_v38  ;;  %v480_v47 = vld [vmem:[%s938_s20 + $0x20] sm:$0xff]  ;;  %v479_v48 = vld [vmem:[%s938_s20 + $0x18] sm:$0xff]  ;;  %v478_v49 = vld [vmem:[%s938_s20 + $0x10] sm:$0xff] }
  0x41   : > { %398 = vmatpush1.msra.mxu0 %v367_v17  ;;  %751 = vmatpush3.msra.mxu1 %v489_v38  ;;  %v477_v50 = vld [vmem:[%s938_s20 + $0x8] sm:$0xff]  ;;  %v476_v51 = vld [vmem:[%s938_s20] sm:$0xff]  ;;  %v568_v10 = vld [vmem:[#allocation2 + $0x8] sm:$0xff] }
  0x42   : > { %399 = vmatprep.subr.mxu0 %v366_v18  ;;  %752 = vmatprep.subr.mxu1 %v488_v39  ;;  %v569_v52 = vld [vmem:[%s928_s12] sm:$0xff]  ;;  %v570_v54 = vld [vmem:[%s928_s12 + $0x8] sm:$0xff] }
  0x43   : > { %400 = vmatpush1.msra.mxu0 %v365_v19  ;;  %753 = vmatpush3.msra.mxu1 %v488_v39  ;;  %v567_v13 = vld [vmem:[#allocation2] sm:$0xff] }
  0x44   : > { %401 = vmatprep.subr.mxu0 %v364_v20  ;;  %754 = vmatprep.subr.mxu1 %v487_v40 }
  0x45   : > { %402 = vmatpush1.msra.mxu0 %v363_v21  ;;  %755 = vmatpush3.msra.mxu1 %v487_v40 }
  0x46   : > { %403 = vmatprep.subr.mxu0 %v362_v22  ;;  %756 = vmatprep.subr.mxu1 %v486_v41 }
  0x47   : > { %404 = vmatpush1.msra.mxu0 %v361_v23  ;;  %757 = vmatpush3.msra.mxu1 %v486_v41 }
  0x48   : > { %405 = vmatprep.subr.mxu0 %v360_v24  ;;  %758 = vmatprep.subr.mxu1 %v485_v42 }
  0x49   : > { %406 = vmatpush1.msra.mxu0 %v359_v25  ;;  %759 = vmatpush3.msra.mxu1 %v485_v42 }
  0x4a   : > { %407 = vmatprep.subr.mxu0 %v358_v26  ;;  %760 = vmatprep.subr.mxu1 %v484_v43 }
  0x4b   : > { %408 = vmatpush1.msra.mxu0 %v357_v27  ;;  %761 = vmatpush3.msra.mxu1 %v484_v43 }
  0x4c   : > { %409 = vmatprep.subr.mxu0 %v356_v28  ;;  %762 = vmatprep.subr.mxu1 %v483_v44 }
  0x4d   : > { %410 = vmatpush1.msra.mxu0 %v355_v29  ;;  %763 = vmatpush3.msra.mxu1 %v483_v44 }
  0x4e   : > { %411 = vmatprep.subr.mxu0 %v354_v30  ;;  %764 = vmatprep.subr.mxu1 %v482_v45 }
  0x4f   : > { %412 = vmatpush1.msra.mxu0 %v353_v31  ;;  %765 = vmatpush3.msra.mxu1 %v482_v45 }
  0x50   : > { %413 = vmatprep.subr.mxu0 %v352_v32  ;;  %766 = vmatprep.subr.mxu1 %v481_v46 }
  0x51   : > { %414 = vmatpush1.msra.mxu0 %v351_v33  ;;  %767 = vmatpush3.msra.mxu1 %v481_v46 }
  0x52   : > { %448 = vmatmul.mubr.f32.vlgmr.msra.gmra.mxu0 %v349_v34  ;;  %768 = vmatprep.subr.mxu1 %v480_v47 }
  0x53   : > { %453 = vmatprep.mubr.f32.mxu0 %v858_v5  ;;  %769 = vmatpush3.msra.mxu1 %v480_v47 }
  0x54   : > { %770 = vmatprep.subr.mxu1 %v479_v48  ;;  %573 = vperm.xlu0 %809, %v569_v52  }
  0x55   : > { %771 = vmatpush3.msra.mxu1 %v479_v48 }
  0x56   : > { %454 = vmatmul.mubr.f32.gmra.mxu0 %v350_v35  ;;  %772 = vmatprep.subr.mxu1 %v478_v49 }
  0x57   : > { %773 = vmatpush3.msra.mxu1 %v478_v49 }
  0x58   : > { %774 = vmatprep.subr.mxu1 %v477_v50  ;;  %578 = vperm.xlu0 %809, %v570_v54  }
  0x59   : > { %775 = vmatpush3.msra.mxu1 %v477_v50 }
  0x5a   : > { %776 = vmatprep.subr.mxu1 %v476_v51 }
  0x5b   : > { %777 = vmatpush3.msra.mxu1 %v476_v51 }
  0xcf   : > { %v574_v7 = vpop.permute.xlu0 %573 }
  0xd3   : > { %v579_v8 = vpop.permute.xlu0 %578 }
 0x112   : > { %v449_v55 = vpop.f32.mrf.mxu0 }
 0x113   : > { %v718_v56 = vmul.f32 -1.442695, %v449_v55 }
 0x114   : > { %v451_v57 = vpop.f32.mrf.mxu0 }
 0x115   : > { %810 = vpow2.f32 %v718_v56 }
 0x116   : > { %v455_v58 = vpop.f32.mrf.mxu0 }
 0x117   : > { %v719_v59 = vmul.f32 -1.442695, %v455_v58 }
 0x118   : > { %v457_v5 = vpop.f32.mrf.mxu0 }
 0x119   : > { %812 = vpow2.f32 %v719_v59 }
 0x122   : > { %v811_v60 = vpop.eup %810 }
 0x123   : > { %v466_v61 = vadd.f32 1.0, %v811_v60 }
 0x125   : > { %814 = vrcp.f32 %v466_v61 }
 0x126   : > { %v813_v62 = vpop.eup %812 }
 0x127   : > { %v467_v63 = vadd.f32 1.0, %v813_v62 }
 0x129   : > { %816 = vrcp.f32 %v467_v63 }
 0x132   : > { %v815_v0 = vpop.eup %814 }
 0x133   : > { %v472_v1 = vmul.f32 %v815_v0, %v449_v55 }
 0x135   : > { %v474_v2 = vmul.f32 %v472_v1, %v451_v57 }
 0x136   : > { %v817_v3 = vpop.eup %816 }
 0x137   : > { %v473_v4 = vmul.f32 %v817_v3, %v455_v58  ;;  %778 = vmatprep.mubr.f32.mxu1 %v474_v2 }
 0x139   : > { %v475_v6 = vmul.f32 %v473_v4, %v457_v5 }
 0x13b   : > { %779 = vmatmul.mubr.f32.vlgmr.msra.gmra.mxu1 %v475_v6 }
 0x1fb   : > { %v780_v9 = vpop.f32.mrf.mxu1 }
 0x1fc   : > { %v582_v11 = vmul.f32 %v780_v9, %v579_v8 }
 0x1fd   : > { %v558_v12 = vpop.f32.mrf.mxu1 }
 0x1fe   : > { %v584_v14 = vadd.f32 %v582_v11, %v568_v10  ;;  %v581_v15 = vmul.f32 %v574_v7, %v558_v12 }
 0x200   : > { %586 = vst [vmem:[#allocation2 + $0x8] sm:$0xff] %v584_v14  ;;  %v583_v16 = vadd.f32 %v581_v15, %v567_v13 }
 0x202   : > { %585 = vst [vmem:[#allocation2] sm:$0xff] %v583_v16 }
 0x203 PF: > { %p720_p0 = scmp.ne.s32.totalorder %s846_s28, 7 }
 0x205   : > { %590 = sbr.rel (%p720_p0) target bundleno = 524 (0x20c), region = 48 }
 0x20a   : > { %v591_v17 = vld [vmem:[#allocation2] sm:$0xff]  ;;  %v592_v18 = vld [vmem:[#allocation2 + $0x8] sm:$0xff] }
 0x20b   : > { %593 = vst [vmem:[%s1020_s6] sm:$0xff] %v591_v17  ;;  %594 = vst [vmem:[%s1020_s6 + $0x8] sm:$0xff] %v592_v18 }
 0x20c PF: > { %s23_s29 = sadd.s32 1, %s854_s29   ;;  %s1021_s28 = smov %s850_s0 }
 0x20d   : > { %p20_p1 = scmp.ge.s32.totalorder %s23_s29, 10   ;;  %s1022_s0 = smov %s1024_s1 }
 0x20f   :  { %22 = sbr.rel (!%p20_p1) target bundleno = 17 (0x11), region = 87 }

</bundles_post_ra>
